<compile_context>
chip_gen: v7x
topology: tpu7x:2x2x1
jax: 0.10.0
libtpu: 0.0.40
codegen_flags: <defaults>
</compile_context>

<pallas_src>
import math

import jax
import jax.numpy as jnp
from jax.experimental import pallas as pl
from jax.experimental.pallas import tpu as pltpu


# ----------------------------- kernels -----------------------------

def _tile_loss(x, t, pw):
    """Element-wise BCE-with-logits loss for one tile, in f32."""
    x = x.astype(jnp.float32)
    t = t.astype(jnp.float32)
    pwm1 = pw.astype(jnp.float32) - 1.0                       # (1, C) row, formed once
    sp_neg = jnp.maximum(-x, 0.0) + jnp.log1p(jnp.exp(-jnp.abs(x)))   # softplus(-x)
    return sp_neg * (1.0 + t * pwm1) + x * (1.0 - t)


def _setl_kernel_single(logit_ref, target_ref, posw_ref, out_ref):
    """steps == 1 fast path: no scratch; reduce the tile and write the lane-dense
    (1, 1, C) partial row for this shard directly."""
    loss = _tile_loss(logit_ref[...], target_ref[...], posw_ref[...])
    out_ref[...] = jnp.sum(loss, axis=0, keepdims=True)[None]


def _setl_kernel_multi(logit_ref, target_ref, posw_ref, out_ref, acc_ref):
    """steps > 1: accumulate into a small (8, C) VMEM slab (pure VPU adds per step);
    single cross-sublane reduce on the last step of the shard."""
    s = pl.program_id(0)          # shard axis (parallel across TensorCores on v7x)
    i = pl.program_id(1)          # reduction over batch tiles within the shard

    @pl.when(i == 0)
    def _():
        acc_ref[s] = jnp.zeros(acc_ref.shape[1:], jnp.float32)

    loss = _tile_loss(logit_ref[...], target_ref[...], posw_ref[...])
    tb, c = loss.shape
    # Layout-trivial sublane-group reshape; axis-0 sum is slab-wise VPU adds.
    acc_ref[s] += loss.reshape(tb // 8, 8, c).sum(axis=0)

    @pl.when(i == pl.num_programs(1) - 1)
    def _():
        out_ref[...] = jnp.sum(acc_ref[s], axis=0, keepdims=True)[None]


# ----------------------------- wrapper helpers -----------------------------

def _lane_pack_factor(rows, classes):
    """k such that reshaping (rows, classes) -> (rows//k, k*classes) makes the last dim
    a multiple of 128 (lane-dense); 1 if packing does not apply."""
    if classes >= 128 or classes <= 0 or classes % 128 == 0:
        return 1
    k = 128 // math.gcd(classes, 128)
    return k if (k > 1 and rows % k == 0) else 1


def _default_num_shards(rows, align):
    """2 on v7x (2 TensorCores per chip) when the batch splits into aligned halves."""
    if rows % (2 * align) != 0:
        return 1
    try:
        kind = jax.devices()[0].device_kind.lower()
    except Exception:
        return 1
    return 2 if "v7" in kind else 1


def _auto_tile_b(rows_per_shard, classes, itemsize, align, target_tile_bytes=1 << 20):
    """Rows per input tile near the measured bandwidth plateau (~1 MiB input tiles);
    the whole shard in one tile when it already fits."""
    cap = max(align, (target_tile_bytes // max(1, classes * itemsize)) // align * align)
    if rows_per_shard <= cap:
        return rows_per_shard                 # single-step fast path
    for t in range(cap, align - 1, -align):   # prefer an exact divisor (no padding)
        if rows_per_shard % t == 0:
            return t
    return cap                                # ragged tail handled by wrapper padding


# ----------------------------- public wrapper -----------------------------

def sound_event_triage_loss(logit, targets, weight, *, tile_b=None, num_shards=None):
    """loss = BCEWithLogitsLoss(reduction='none', pos_weight=weight)(logit, targets).mean()

    logit, targets: (B, C); weight (pos_weight): (C,).
    HBM-byte savers (kernel upcasts to f32): bf16 logits, int8 {0,1} targets.
    """
    B, C0 = logit.shape
    assert targets.shape == (B, C0)
    assert weight.shape == (C0,)
    n_elems = B * C0

    # Lane-pack small class counts so every vreg / EUP push / DMA burst is lane-dense.
    k = _lane_pack_factor(B, C0)
    if k > 1:
        logit = logit.reshape(B // k, k * C0)
        targets = targets.reshape(B // k, k * C0)
        posw = jnp.tile(weight.reshape(1, C0), (1, k))
    else:
        posw = weight.reshape(1, C0)
    rows, C = logit.shape

    it_l = jnp.dtype(logit.dtype).itemsize
    it_t = jnp.dtype(targets.dtype).itemsize
    # Sublane granule of the narrowest input dtype (f32->8, bf16->16, int8->32).
    align = 8 * (4 // min(4, it_l, it_t))

    if num_shards is None:
        num_shards = _default_num_shards(rows, align)
    if num_shards > 1 and rows % (num_shards * align) != 0:
        num_shards = 1
    rows_per_shard = rows if num_shards == 1 else rows // num_shards

    if tile_b is None:
        tile_b = _auto_tile_b(rows_per_shard, C, max(it_l, it_t), align)
    if (num_shards > 1 or tile_b < rows_per_shard) and tile_b % align != 0:
        tile_b = -(-tile_b // align) * align   # sublane-align when block != full rows
    steps = -(-rows_per_shard // tile_b)

    # Pad the batch so it splits into num_shards * steps tiles.  Pad rows are
    # (x = -30, t = 0), whose loss is exactly 0 in f32, so the sum is unchanged.
    padded_rows = num_shards * steps * tile_b
    if padded_rows != rows:
        pad = padded_rows - rows
        logit = jnp.concatenate(
            [logit, jnp.full((pad, C), -30.0, dtype=logit.dtype)], axis=0)
        targets = jnp.concatenate(
            [targets, jnp.zeros((pad, C), dtype=targets.dtype)], axis=0)

    # Explicit VMEM limit from the actual footprint (2 double-buffered input tiles plus
    # small posw/acc/out), generous headroom, well under every generation's VMEM.
    tile_in_bytes = tile_b * C * (it_l + it_t)
    vmem_limit = int(min(32 << 20, max(8 << 20, 4 * tile_in_bytes + (2 << 20))))

    out_shape = jax.ShapeDtypeStruct((num_shards, 1, C), jnp.float32)

    if steps == 1:
        partials = pl.pallas_call(
            _setl_kernel_single,
            out_shape=out_shape,
            grid_spec=pltpu.PrefetchScalarGridSpec(
                num_scalar_prefetch=0,
                grid=(num_shards,),
                in_specs=[
                    pl.BlockSpec((tile_b, C), lambda s: (s, 0)),
                    pl.BlockSpec((tile_b, C), lambda s: (s, 0)),
                    pl.BlockSpec((1, C), lambda s: (0, 0)),      # pos_weight resident
                ],
                out_specs=pl.BlockSpec((1, 1, C), lambda s: (s, 0, 0)),
            ),
            compiler_params=pltpu.CompilerParams(
                dimension_semantics=("parallel",),
                vmem_limit_bytes=vmem_limit,
            ),
        )(logit, targets, posw)
    else:
        partials = pl.pallas_call(
            _setl_kernel_multi,
            out_shape=out_shape,
            grid_spec=pltpu.PrefetchScalarGridSpec(
                num_scalar_prefetch=0,
                grid=(num_shards, steps),
                in_specs=[
                    pl.BlockSpec((tile_b, C), lambda s, i: (s * steps + i, 0)),
                    pl.BlockSpec((tile_b, C), lambda s, i: (s * steps + i, 0)),
                    pl.BlockSpec((1, C), lambda s, i: (0, 0)),   # pos_weight resident
                ],
                out_specs=pl.BlockSpec((1, 1, C), lambda s, i: (s, 0, 0)),
                scratch_shapes=[pltpu.VMEM((num_shards, 8, C), jnp.float32)],
            ),
            compiler_params=pltpu.CompilerParams(
                dimension_semantics=("parallel", "arbitrary"),
                vmem_limit_bytes=vmem_limit,
            ),
        )(logit, targets, posw)

    return jnp.sum(partials) / jnp.float32(n_elems)


def sound_event_triage_loss_ref(logit, targets, weight):
    """Pure-JAX reference mirroring torch BCEWithLogitsLoss(pos_weight=weight).mean()."""
    x = logit.astype(jnp.float32)
    t = targets.astype(jnp.float32)
    pw = weight.astype(jnp.float32)
    log_sig = -jax.nn.softplus(-x)            # log(sigmoid(x))
    log_1m_sig = -x - jax.nn.softplus(-x)     # log(1 - sigmoid(x))
    loss = -(pw * t * log_sig + (1.0 - t) * log_1m_sig)
    return loss.mean()


if __name__ == "__main__":
    key = jax.random.PRNGKey(0)
    k1, k2, k3, k4, k5 = jax.random.split(key, 5)

    # Case 1: f32 inputs, single-tile fast path (B=16, C=128).
    B, C = 16, 128
    logit = jax.random.normal(k1, (B, C), dtype=jnp.float32) * 2.0
    targets = (jax.random.uniform(k2, (B, C)) > 0.7).astype(jnp.float32)
    weight = jax.random.uniform(k3, (C,), minval=0.5, maxval=3.0).astype(jnp.float32)

    loss = jax.block_until_ready(sound_event_triage_loss(logit, targets, weight))
    ref = jax.block_until_ready(sound_event_triage_loss_ref(logit, targets, weight))
    assert jnp.allclose(loss, ref, rtol=1e-5, atol=1e-5), (loss, ref)

    # Case 2: bf16 logits + int8 targets (reduced HBM bytes); kernel upcasts to f32.
    logit_bf16 = logit.astype(jnp.bfloat16)
    targets_i8 = targets.astype(jnp.int8)
    loss2 = jax.block_until_ready(
        sound_event_triage_loss(logit_bf16, targets_i8, weight))
    ref2 = jax.block_until_ready(
        sound_event_triage_loss_ref(logit_bf16, targets_i8, weight))
    assert jnp.allclose(loss2, ref2, rtol=1e-4, atol=1e-4), (loss2, ref2)

    # Case 3: multi-step accumulation + ragged batch padded in the wrapper
    # (B=200 with tile_b=64 -> 4 steps over a padded 256-row batch).
    B3, C3 = 200, 128
    logit3 = jax.random.normal(k4, (B3, C3), dtype=jnp.float32)
    targets3 = (jax.random.uniform(k5, (B3, C3)) > 0.5).astype(jnp.float32)
    loss3 = jax.block_until_ready(
        sound_event_triage_loss(logit3, targets3, weight, tile_b=64))
    ref3 = jax.block_until_ready(sound_event_triage_loss_ref(logit3, targets3, weight))
    assert jnp.allclose(loss3, ref3, rtol=1e-5, atol=1e-5), (loss3, ref3)

    # Case 4: small class count lane-packed ((64, 16) -> (8, 128) with tiled pos_weight).
    B4, C4 = 64, 16
    k6, k7, k8 = jax.random.split(k4, 3)
    logit4 = jax.random.normal(k6, (B4, C4), dtype=jnp.float32)
    targets4 = (jax.random.uniform(k7, (B4, C4)) > 0.6).astype(jnp.float32)
    weight4 = jax.random.uniform(k8, (C4,), minval=0.5, maxval=2.0).astype(jnp.float32)
    loss4 = jax.block_until_ready(sound_event_triage_loss(logit4, targets4, weight4))
    ref4 = jax.block_until_ready(sound_event_triage_loss_ref(logit4, targets4, weight4))
    assert jnp.allclose(loss4, ref4, rtol=1e-5, atol=1e-5), (loss4, ref4)

    print("KERNEL_OK")
</pallas_src>

<mosaic_0001>
module attributes {stable_mosaic.version = 11 : i64} {
  func.func @_setl_kernel_single(%arg0: i32, %arg1: memref<16x128xf32, #tpu.memory_space<vmem>>, %arg2: memref<16x128xf32, #tpu.memory_space<vmem>>, %arg3: memref<1x128xf32, #tpu.memory_space<vmem>>, %arg4: memref<1x1x128xf32, #tpu.memory_space<vmem>>) attributes {dimension_semantics = [#tpu.dimension_semantics<parallel>], iteration_bounds = array<i64: 1>, scalar_prefetch = 0 : i64, scratch_operands = 0 : i64, tpu.core_type = #tpu.core_type<tc>, window_params = [{transform_indices = @transform_0, window_bounds = array<i64: 16, 128>}, {transform_indices = @transform_1, window_bounds = array<i64: 16, 128>}, {pipeline_mode = #tpu.pipeline_mode<synchronous>, transform_indices = @transform_2, window_bounds = array<i64: 1, 128>}, {transform_indices = @transform_3, window_bounds = array<i64: 1, 1, 128>}]} {
    %c0 = arith.constant 0 : index
    %c0_0 = arith.constant 0 : index
    %0 = vector.load %arg1[%c0, %c0_0] : memref<16x128xf32, #tpu.memory_space<vmem>>, vector<16x128xf32>
    %c0_1 = arith.constant 0 : index
    %c0_2 = arith.constant 0 : index
    %1 = vector.load %arg2[%c0_1, %c0_2] : memref<16x128xf32, #tpu.memory_space<vmem>>, vector<16x128xf32>
    %c0_3 = arith.constant 0 : index
    %c0_4 = arith.constant 0 : index
    %2 = vector.load %arg3[%c0_3, %c0_4] : memref<1x128xf32, #tpu.memory_space<vmem>>, vector<1x128xf32>
    %cst = arith.constant 1.000000e+00 : f32
    %3 = vector.broadcast %cst : f32 to vector<1x128xf32>
    %4 = arith.subf %2, %3 : vector<1x128xf32>
    %cst_5 = arith.constant 0.000000e+00 : f32
    %5 = vector.broadcast %cst_5 : f32 to vector<16x128xf32>
    %6 = arith.subf %5, %0 : vector<16x128xf32>
    %cst_6 = arith.constant 0.000000e+00 : f32
    %7 = vector.broadcast %cst_6 : f32 to vector<16x128xf32>
    %8 = arith.maximumf %6, %7 : vector<16x128xf32>
    %9 = math.absf %0 : vector<16x128xf32>
    %cst_7 = arith.constant 0.000000e+00 : f32
    %10 = vector.broadcast %cst_7 : f32 to vector<16x128xf32>
    %11 = arith.subf %10, %9 : vector<16x128xf32>
    %12 = math.exp %11 : vector<16x128xf32>
    %13 = math.log1p %12 : vector<16x128xf32>
    %14 = arith.addf %8, %13 : vector<16x128xf32>
    %15 = vector.broadcast %4 : vector<1x128xf32> to vector<16x128xf32>
    %16 = arith.mulf %1, %15 : vector<16x128xf32>
    %cst_8 = arith.constant 1.000000e+00 : f32
    %17 = vector.broadcast %cst_8 : f32 to vector<16x128xf32>
    %18 = arith.addf %17, %16 : vector<16x128xf32>
    %19 = arith.mulf %14, %18 : vector<16x128xf32>
    %cst_9 = arith.constant 1.000000e+00 : f32
    %20 = vector.broadcast %cst_9 : f32 to vector<16x128xf32>
    %21 = arith.subf %20, %1 : vector<16x128xf32>
    %22 = arith.mulf %0, %21 : vector<16x128xf32>
    %23 = arith.addf %19, %22 : vector<16x128xf32>
    %cst_10 = arith.constant dense<0.000000e+00> : vector<128xf32>
    %24 = vector.multi_reduction <add>, %23, %cst_10 [0] : vector<16x128xf32> to vector<128xf32>
    %25 = vector.shape_cast %24 : vector<128xf32> to vector<1x128xf32>
    %26 = vector.shape_cast %25 : vector<1x128xf32> to vector<1x1x128xf32>
    %c0_11 = arith.constant 0 : index
    %c0_12 = arith.constant 0 : index
    %c0_13 = arith.constant 0 : index
    %27 = vector.load %arg4[%c0_11, %c0_12, %c0_13] : memref<1x1x128xf32, #tpu.memory_space<vmem>>, vector<1x1x128xf32>
    tpu.vector_store %arg4[%c0_11, %c0_12, %c0_13], %26 {strides = array<i32>} : memref<1x1x128xf32, #tpu.memory_space<vmem>>, vector<1x1x128xf32>,
    return
  }
  func.func @transform_0(%arg0: i32) -> (i32, i32) {
    %c0_i32 = arith.constant 0 : i32
    %c0_i32_0 = arith.constant 0 : i32
    return %arg0, %c0_i32 : i32, i32
  }
  func.func @transform_1(%arg0: i32) -> (i32, i32) {
    %c0_i32 = arith.constant 0 : i32
    %c0_i32_0 = arith.constant 0 : i32
    return %arg0, %c0_i32 : i32, i32
  }
  func.func @transform_2(%arg0: i32) -> (i32, i32) {
    %c0_i32 = arith.constant 0 : i32
    %c0_i32_0 = arith.constant 0 : i32
    %c0_i32_1 = arith.constant 0 : i32
    return %c0_i32, %c0_i32_0 : i32, i32
  }
  func.func @transform_3(%arg0: i32) -> (i32, i32, i32) {
    %c0_i32 = arith.constant 0 : i32
    %c0_i32_0 = arith.constant 0 : i32
    %c0_i32_1 = arith.constant 0 : i32
    return %arg0, %c0_i32, %c0_i32_0 : i32, i32, i32
  }
}

</mosaic_0001>

<bundles_post_ra>
// kernel: tpu_custom_call.1
= control target key start
LH: loop header
LB: loop body
LE: loop exit
PB: predicated region body
PF: predicated region fallthrough
CT: control target
= control target key end

     0   :  { %8 = vsyncpa [#allocation3], 0  ;;  %s273_s0 = inlined_call_operand.hbm [shape: f32[16,128], index: 0, kind: input, shape index: {}]   ;;  %s274_s1 = inlined_call_operand.hbm [shape: f32[16,128], index: 1, kind: input, shape index: {}]   ;;  %s275_s2 = inlined_call_operand.vmem [shape: f32[1,128], index: 2, kind: input, shape index: {}]   ;;  %s276_s3 = inlined_call_operand.hbm [shape: f32[1,1,128], index: 3, kind: output, shape index: {}]  }
   0x1   :  { %9 = vsyncpa [#allocation6], 0 }
   0x2   :  { %10 = vsyncpa [#allocation4], 0  ;;  %s209_s12 = smov [#allocation2]   ;;  %s137_s16 = scalar_lea.hbm %s273_s0, 256 }
   0x3   :  { %s16_s13 = sshll.u32 %s209_s12, 4  ;;  %p138_p0 = scmp.ne.s32.totalorder %s273_s0, %s137_s16  ;;  %s17_s13 = int_to_ptr.vmem [resolvable:$true] %s16_s13 }
   0x4   :  { %p141_p1 = scmp.lt.u32.totalorder %s137_s16, %s273_s0 }
   0x6   :  { %p143_p2 = pnand %p141_p1, %p138_p0 }
   0x8   :  { %146 = shalt.err (!%p143_p2)
}
   0x9   :  { %s147_s21 = scalar_lea.vmem %s17_s13, 256  ;;  %p152_p4 = scmp.lt.s32.totalorder %s17_s13, %s17_s13 }
   0xa   :  { %p148_p3 = scmp.ne.s32.totalorder %s17_s13, %s147_s21  ;;  %p153_p5 = scmp.lt.s32.totalorder %s147_s21, %s147_s21 }
   0xc   :  { %p154_p6 = por %p153_p5, %p152_p4 }
   0xe   :  { %p155_p7 = pnand %p154_p6, %p148_p3 }
  0x10   :  { %158 = shalt.err (!%p155_p7)
}
  0x11   :  { %s210_s22 = smov 128   ;;  %s211_s23 = smov 8  }
  0x12   :  { %22 = dma.hbm_to_vmem [thread:$0]  %s273_s0, 256, %s17_s13, [#allocation3], %s210_s22, %s210_s22, %s211_s23  }
  0x13   :  { %s212_s26 = smov [#allocation5]   ;;  %s159_s30 = scalar_lea.hbm %s274_s1, 256 }
  0x14   :  { %s28_s27 = sshll.u32 %s212_s26, 4  ;;  %p160_p8 = scmp.ne.s32.totalorder %s274_s1, %s159_s30  ;;  %s29_s27 = int_to_ptr.vmem [resolvable:$true] %s28_s27 }
  0x15   :  { %p163_p9 = scmp.lt.u32.totalorder %s159_s30, %s274_s1 }
  0x17   :  { %p165_p10 = pnand %p163_p9, %p160_p8 }
  0x19   :  { %168 = shalt.err (!%p165_p10)
}
  0x1a   :  { %s169_s8 = scalar_lea.vmem %s29_s27, 256  ;;  %p174_p12 = scmp.lt.s32.totalorder %s29_s27, %s29_s27 }
  0x1b   :  { %p170_p11 = scmp.ne.s32.totalorder %s29_s27, %s169_s8  ;;  %p175_p13 = scmp.lt.s32.totalorder %s169_s8, %s169_s8 }
  0x1d   :  { %p176_p0 = por %p175_p13, %p174_p12 }
  0x1f   :  { %p177_p1 = pnand %p176_p0, %p170_p11 }
  0x21   :  { %180 = shalt.err (!%p177_p1)
}
  0x22   :  { %34 = dma.hbm_to_vmem [thread:$0]  %s274_s1, 256, %s29_s27, [#allocation6], %s210_s22, %s210_s22, %s211_s23  }
  0x23   :  { %203 = dma.done.wait [#allocation3], 256  }
  0x24   :  { %204 = vsyncadd [#allocation3], 4294967040 }
  0x25   :  { %205 = dma.done.wait [#allocation6], 256  }
  0x26   :  { %206 = vsyncadd [#allocation6], 4294967040  ;;  %v43_v0 = vld [vmem:[#allocation2] sm:$0xff]  ;;  %v44_v1 = vld [vmem:[#allocation2 + $0x8] sm:$0xff]  ;;  %v82_v8 = vlaneseq  ;;  %s213_s1 = smov [#allocation7]  }
  0x27   :  { %v53_v2 = vand.u32 2147483647, %v43_v0  ;;  %v54_v3 = vand.u32 2147483647, %v44_v1  ;;  %v47_v11 = vld [vmem:[%s275_s2] sm:$0x1] }
  0x28   :  { %v83_v9 = vshrl.u32 %v82_v8, 7  ;;  %v123_v15 = vadd.f32 -1.0, %v47_v11  ;;  %v45_v20 = vld [vmem:[#allocation5] sm:$0xff]  ;;  %v46_v22 = vld [vmem:[#allocation5 + $0x8] sm:$0xff]  ;;  %v49_v23 = vsub.f32 0.0, %v43_v0  ;;  %v50_v26 = vsub.f32 0.0, %v44_v1 }
  0x29   :  { %v55_v4 = vsub.f32 0.0, %v53_v2  ;;  %v56_v5 = vsub.f32 0.0, %v54_v3  ;;  %v93_v34 = vsub.f32 1.0, %v45_v20  ;;  %v94_v38 = vsub.f32 1.0, %v46_v22  ;;  %s113_s2 = sshll.u32 %s213_s1, 4  ;;  %s114_s2 = int_to_ptr.vmem [resolvable:$true] %s113_s2 }
  0x2a   :  { %v84_v16 = vsub.s32 0, %v83_v9  ;;  %v51_v32 = vmax.f32 %v49_v23, 0.0  ;;  %v52_v36 = vmax.f32 %v50_v26, 0.0  ;;  %s181_s12 = scalar_lea.vmem %s114_s2, 16  ;;  %s185_s13 = scalar_lea.vmem %s114_s2, 32 }
  0x2b   :  { %v57_v6 = vmul.f32 1.442695, %v55_v4  ;;  %v59_v7 = vmul.f32 1.442695, %v56_v5  ;;  %v95_v45 = vmul.f32 %v93_v34, %v43_v0  ;;  %v96_v47 = vmul.f32 %v94_v38, %v44_v1  ;;  %p182_p2 = scmp.ne.s32.totalorder %s114_s2, %s181_s12  ;;  %p186_p3 = scmp.lt.s32.totalorder %s114_s2, %s114_s2 }
  0x2c   :  { %v85_v19 = vrot.slane %v123_v15, %v84_v16  ;;  %p187_p4 = scmp.lt.s32.totalorder %s185_s13, %s181_s12 }
  0x2d   :  { %129 = vpow2.f32 %v57_v6 }
  0x2e   :  { %131 = vpow2.f32 %v59_v7  ;;  %v87_v28 = vmul.f32 %v85_v19, %v45_v20  ;;  %v88_v30 = vmul.f32 %v85_v19, %v46_v22  ;;  %p188_p5 = por %p187_p4, %p186_p3 }
  0x30   :  { %v89_v40 = vadd.f32 1.0, %v87_v28  ;;  %v90_v42 = vadd.f32 1.0, %v88_v30  ;;  %p189_p6 = pnand %p188_p5, %p182_p2 }
  0x37   :  { %v130_v10 = vpop.eup %129 }
  0x38   :  { %v132_v12 = vpop.eup %131  ;;  %v61_v13 = vadd.f32 1.0, %v130_v10  ;;  %v64_v17 = vmul.f32 -0.5, %v130_v10  ;;  %v67_v24 = vand.u32 2147483647, %v130_v10 }
  0x39   :  { %v70_v14 = vadd.f32 1.0, %v132_v12  ;;  %v73_v18 = vmul.f32 -0.5, %v132_v12  ;;  %v76_v27 = vand.u32 2147483647, %v132_v12 }
  0x3a   :  { %133 = vlog2.f32 %v61_v13  ;;  %v65_v21 = vadd.f32 1.0, %v64_v17  ;;  %vm68_vm0 = vcmp.lt.f32.partialorder %v67_v24, 0.0004427343 }
  0x3b   :  { %135 = vlog2.f32 %v70_v14  ;;  %v74_v25 = vadd.f32 1.0, %v73_v18  ;;  %vm77_vm1 = vcmp.lt.f32.partialorder %v76_v27, 0.0004427343 }
  0x3c   :  { %v66_v29 = vmul.f32 %v130_v10, %v65_v21 }
  0x3d   :  { %v75_v33 = vmul.f32 %v132_v12, %v74_v25 }
  0x44   :  { %v134_v31 = vpop.eup %133 }
  0x45   :  { %v136_v35 = vpop.eup %135  ;;  %v63_v37 = vmul.f32 0.6931472, %v134_v31 }
  0x46   :  { %v72_v39 = vmul.f32 0.6931472, %v136_v35 }
  0x47   :  { %v69_v41 = vsel %vm68_vm0, %v66_v29, %v63_v37 }
  0x48   :  { %v78_v43 = vsel %vm77_vm1, %v75_v33, %v72_v39  ;;  %v79_v44 = vadd.f32 %v69_v41, %v51_v32 }
  0x49   :  { %v80_v46 = vadd.f32 %v78_v43, %v52_v36 }
  0x4a   :  { %v91_v48 = vmul.f32 %v89_v40, %v79_v44 }
  0x4b   :  { %v92_v49 = vmul.f32 %v90_v42, %v80_v46 }
  0x4c   :  { %v97_v50 = vadd.f32 %v95_v45, %v91_v48 }
  0x4d   :  { %v98_v51 = vadd.f32 %v96_v47, %v92_v49 }
  0x4f   :  { %v99_v52 = vadd.f32 %v98_v51, %v97_v50 }
  0x51   :  { %v100_v53 = vrot.slane %v99_v52, 4 }
  0x53   :  { %v101_v54 = vadd.f32 %v100_v53, %v99_v52 }
  0x55   :  { %v102_v55 = vrot.slane %v101_v54, 2 }
  0x57   :  { %v103_v56 = vadd.f32 %v102_v55, %v101_v54 }
  0x59   :  { %v104_v57 = vrot.slane %v103_v56, 1 }
  0x5b   :  { %v105_v58 = vadd.f32 %v104_v57, %v103_v56 }
  0x5d   :  { %106 = vst [vmem:[#allocation7] sm:$0x1] %v105_v58 }
  0x5e   :  { %192 = shalt.err (!%p189_p6)
}
  0x5f   :  { %s193_s16 = scalar_lea.hbm %s276_s3, 16 }
  0x60   :  { %p194_p7 = scmp.ne.s32.totalorder %s276_s3, %s193_s16  ;;  %p197_p8 = scmp.lt.u32.totalorder %s193_s16, %s276_s3 }
  0x62   :  { %p199_p9 = pnand %p197_p8, %p194_p7 }
  0x64   :  { %202 = shalt.err (!%p199_p9)
}
  0x65   :  { %116 = dma.vmem_to_hbm [thread:$0]  %s114_s2, 16, %s276_s3, [#allocation4]  }
  0x66   :  { %207 = dma.done.wait [#allocation4], 16  }
  0x67   :  { %208 = vsyncadd [#allocation4], 4294967280 }
  0x68   :  { %120 = vsyncpa [#allocation3], 1 }
  0x69   :  { %121 = vsyncpa [#allocation6], 1 }
  0x6a   :  { %122 = vsyncpa [#allocation4], 1 }

</bundles_post_ra>
